<compile_context>
chip_gen: v5e
topology: v5e:2x2
jax: 0.10.0
libtpu: 0.0.40
codegen_flags: <defaults>
</compile_context>

<pallas_src>
import functools

import jax
import jax.numpy as jnp
from jax.experimental import pallas as pl
from jax.experimental.pallas import tpu as pltpu


# ----------------------------------------------------------------------------
# Small static helpers (all trace-time Python).
# ----------------------------------------------------------------------------
def _round_up(x, m):
    return ((x + m - 1) // m) * m


def _cdiv(a, b):
    return (a + b - 1) // b


@functools.lru_cache(maxsize=None)
def _vmem_capacity_bytes():
    try:
        return int(pltpu.get_tpu_info().vmem_capacity_bytes)
    except Exception:
        return 128 * 1024 * 1024  # v5e / v6e default


@functools.lru_cache(maxsize=None)
def _num_tensorcores():
    """Best-effort TensorCore count (2 on v7x); falls back to 1 (no out split)."""
    try:
        info = pltpu.get_tpu_info()
        for attr in ("num_cores", "core_count", "num_tensorcores"):
            v = getattr(info, attr, None)
            if v:
                return int(v)
    except Exception:
        pass
    return 1


def _pick_tm(M, max_tm=512):
    """Row-tile size: big tiles, 16-row aligned (bf16 sublane packing), minimal
    pad waste, bumped to the 256-wide MXU granule when that costs little."""
    if M <= max_tm:
        tm = _round_up(M, 16)
        tm256 = _round_up(M, 256)
        if M >= 192 and tm256 - M <= max(64, M // 3):
            tm = tm256
        return tm
    n_tiles = _cdiv(M, max_tm)
    base = _cdiv(M, n_tiles)
    tm = _round_up(base, 16)
    tm256 = _round_up(base, 256)
    if tm256 <= max_tm and _round_up(M, tm256) - M <= max(64, M // 8):
        tm = tm256
    return tm


def _pick_tn(out_p):
    """Largest of {512, 384, 256, 128} that exactly divides the 128-padded out
    dim (128 always does), so no extra out-dim padding is ever introduced."""
    for tn in (512, 384, 256):
        if out_p % tn == 0:
            return tn
    return 128


def _x_block_spec(tm, in_p, rows):
    """x row-tile spec; deeper (3-buffer) pipelining when there are multiple
    row tiles so the next tile's DMA starts well before the transition."""
    index_map = lambda i, n, j: (i, 0)
    if rows > 1 and hasattr(pl, "Buffered"):
        try:
            return pl.BlockSpec((tm, in_p), index_map,
                                pipeline_mode=pl.Buffered(3))
        except (TypeError, AttributeError):
            pass
    return pl.BlockSpec((tm, in_p), index_map)


# ----------------------------------------------------------------------------
# Kernel
# ----------------------------------------------------------------------------
def _svd_linear_kernel(x_ref, v_ref, sut_ref, b_ref, o_ref, xv_ref):
    # xv-cache contract: grid axis 2 is the innermost, sequentially executed
    # ("arbitrary") axis. The rank-k projection is recomputed whenever that
    # axis restarts, i.e. whenever the (row-tile, core-split) pair changes, so
    # the cached value is always the one for the current row tile on any core.
    @pl.when(pl.program_id(2) == 0)
    def _():
        xv_ref[...] = jnp.dot(
            x_ref[...].astype(v_ref.dtype), v_ref[...],
            preferred_element_type=jnp.float32,
        ).astype(xv_ref.dtype)

    out = jnp.dot(xv_ref[...], sut_ref[...], preferred_element_type=jnp.float32)
    o_ref[...] = (out + b_ref[...]).astype(o_ref.dtype)


# ----------------------------------------------------------------------------
# One-time weight preparation (outside the per-call forward).
# ----------------------------------------------------------------------------
def prepare_svd_params(V_T, SU, bias, compute_dtype=jnp.bfloat16):
    """Transpose + zero-pad the SVD factors once, MXU-natural layout:
         V    [in_p, k_p]   = pad(V_T.T)
         SU_T [k_p, out_p]  = pad(SU.T)
         bias [1, out_p]    (f32)
    Returns (V, SU_T, bias_pad) to be passed to svd_wrapper_forward."""
    k, in_features = V_T.shape
    out_features, k2 = SU.shape
    assert k == k2

    in_p = _round_up(in_features, 128)
    k_p = _round_up(k, 128)
    out_p = _round_up(out_features, 128)

    V = jnp.zeros((in_p, k_p), compute_dtype)
    V = V.at[:in_features, :k].set(V_T.T.astype(compute_dtype))

    SU_T = jnp.zeros((k_p, out_p), compute_dtype)
    SU_T = SU_T.at[:k, :out_features].set(SU.T.astype(compute_dtype))

    bias_pad = jnp.zeros((1, out_p), jnp.float32)
    bias_pad = bias_pad.at[0, :out_features].set(bias.astype(jnp.float32))

    return V, SU_T, bias_pad


# ----------------------------------------------------------------------------
# Forward
# ----------------------------------------------------------------------------
@functools.partial(jax.jit,
                   static_argnames=("out_features", "out_dtype", "tm", "tn"))
def svd_wrapper_forward(x, V, SU_T, bias_pad, *, out_features,
                        out_dtype=None, tm=None, tn=None):
    """Fused low-rank linear: (x @ V_T^T) @ SU^T + bias, as one Pallas kernel."""
    in_p, k_p = V.shape
    out_p = SU_T.shape[1]
    assert bias_pad.shape == (1, out_p)
    compute_dtype = V.dtype
    out_dtype = x.dtype if out_dtype is None else jnp.dtype(out_dtype)

    in_features = x.shape[-1]
    assert in_features <= in_p
    lead_shape = x.shape[:-1]
    x2d = x.reshape(-1, in_features)
    M = x2d.shape[0]

    # Pad the feature dim only when needed (x stays in its own dtype; the
    # kernel casts to the compute dtype in VMEM). The row dim is never padded.
    if in_features != in_p:
        x2d = jnp.pad(x2d, ((0, 0), (0, in_p - in_features)))

    # ---- tile selection (all static at trace time) -------------------------
    cap = _vmem_capacity_bytes()
    small_vmem = cap < 100 * 1024 * 1024          # v7x: 64 MiB per TensorCore
    if tm is None:
        tm = _pick_tm(M)
        if small_vmem and in_p >= 4096:
            tm = min(tm, 256)
    if tn is None:
        tn = _pick_tn(out_p)
    assert out_p % tn == 0

    rows = _cdiv(M, tm)                # last row tile may be partial (masked)
    n_col_tiles = out_p // tn
    # v7x megacore: with a single row tile, split the out axis over a second
    # "parallel" axis so both TensorCores get work (one duplicated rank-k
    # matmul per core, cheap when in_p is moderate).
    nsplit = 2 if (_num_tensorcores() >= 2 and rows == 1
                   and n_col_tiles >= 2 and n_col_tiles % 2 == 0) else 1
    cols = n_col_tiles // nsplit
    grid = (rows, nsplit, cols)

    vmem_limit = min(48 * 1024 * 1024, (cap * 5) // 8)

    x_item = jnp.dtype(x2d.dtype).itemsize
    w_item = jnp.dtype(compute_dtype).itemsize
    o_item = jnp.dtype(out_dtype).itemsize
    cost = pl.CostEstimate(
        flops=int(2 * rows * tm * k_p * (nsplit * in_p + out_p)),
        transcendentals=0,
        bytes_accessed=int(M * in_p * x_item          # x
                           + in_p * k_p * w_item      # V
                           + k_p * out_p * w_item     # SU^T
                           + out_p * 4                # bias
                           + M * out_p * o_item),     # output
    )

    out_pad = pl.pallas_call(
        _svd_linear_kernel,
        out_shape=jax.ShapeDtypeStruct((M, out_p), out_dtype),
        grid_spec=pltpu.PrefetchScalarGridSpec(
            num_scalar_prefetch=0,
            grid=grid,
            in_specs=[
                _x_block_spec(tm, in_p, rows),                           # x row tile
                pl.BlockSpec((in_p, k_p), lambda i, n, j: (0, 0)),       # V (resident)
                pl.BlockSpec((k_p, tn),
                             lambda i, n, j, c=cols: (0, n * c + j)),    # SU^T col tile
                pl.BlockSpec((1, tn),
                             lambda i, n, j, c=cols: (0, n * c + j)),    # bias tile
            ],
            out_specs=pl.BlockSpec((tm, tn),
                                   lambda i, n, j, c=cols: (i, n * c + j)),
            scratch_shapes=[pltpu.VMEM((tm, k_p), compute_dtype)],       # cached xV
        ),
        compiler_params=pltpu.CompilerParams(
            dimension_semantics=("parallel", "parallel", "arbitrary"),
            vmem_limit_bytes=vmem_limit,
        ),
        cost_estimate=cost,
    )(x2d, V, SU_T, bias_pad)

    out = out_pad if out_p == out_features else out_pad[:, :out_features]
    return out.reshape(*lead_shape, out_features)


# ----------------------------------------------------------------------------
# Parameter synthesis (mirrors SVDWrapper.__init__ without a checkpoint).
# ----------------------------------------------------------------------------
def build_svd_params(key, in_features, out_features, k, dtype=jnp.float32):
    kw, kb = jax.random.split(key)
    W = jax.random.normal(kw, (out_features, in_features), dtype=jnp.float32) * 0.05
    bias = jax.random.normal(kb, (out_features,), dtype=jnp.float32) * 0.01

    U, S, V_T = jnp.linalg.svd(W, full_matrices=False)
    U = U[:, :k]
    S = S[:k]
    V_T = V_T[:k, :]
    SU = S[None, :] * U  # [out_features, k]
    return (V_T.astype(dtype), SU.astype(dtype), bias.astype(dtype))


if __name__ == "__main__":
    # Small shapes consistent with a wrapped nn.Linear:
    batch, seq, in_features, out_features, k = 2, 8, 32, 32, 8

    key = jax.random.PRNGKey(0)
    kx, kp = jax.random.split(key)
    x = jax.random.normal(kx, (batch, seq, in_features), dtype=jnp.float32)

    V_T, SU, bias = build_svd_params(kp, in_features, out_features, k)

    # Pure-JAX reference of the module's forward (non-conv1d branch).
    ref = (x @ V_T.T) @ SU.T + bias

    # f32 compute path: tight correctness check.
    params_f32 = prepare_svd_params(V_T, SU, bias, compute_dtype=jnp.float32)
    out_f32 = svd_wrapper_forward(x, *params_f32, out_features=out_features)
    out_f32 = jax.block_until_ready(out_f32)
    assert out_f32.shape == (batch, seq, out_features)
    assert jnp.allclose(out_f32, ref, atol=1e-4, rtol=1e-4), "f32 mismatch vs reference"

    # bf16 MXU-native path (f32 accumulation): looser tolerance.
    params_bf16 = prepare_svd_params(V_T, SU, bias, compute_dtype=jnp.bfloat16)
    out_bf16 = svd_wrapper_forward(x, *params_bf16, out_features=out_features)
    out_bf16 = jax.block_until_ready(out_bf16)
    assert out_bf16.shape == (batch, seq, out_features)
    assert jnp.allclose(out_bf16, ref, atol=5e-2, rtol=5e-2), "bf16 mismatch vs reference"

    # TODO(synk): is_conv1d=True branch (GPT-2 Conv1D weight layout) is the same
    # two-matmul pattern with U / S*V_T swapped; not wired into the kernel here.
    print("KERNEL_OK")
</pallas_src>

<mosaic_0001>
module attributes {stable_mosaic.version = 11 : i64} {
  func.func @_svd_linear_kernel(%arg0: i32, %arg1: i32, %arg2: i32, %arg3: memref<16x128xf32, #tpu.memory_space<vmem>>, %arg4: memref<128x128xf32, #tpu.memory_space<vmem>>, %arg5: memref<128x128xf32, #tpu.memory_space<vmem>>, %arg6: memref<1x128xf32, #tpu.memory_space<vmem>>, %arg7: memref<16x128xf32, #tpu.memory_space<vmem>>, %arg8: memref<16x128xf32, #tpu.memory_space<vmem>>) attributes {dimension_semantics = [#tpu.dimension_semantics<parallel>, #tpu.dimension_semantics<parallel>, #tpu.dimension_semantics<arbitrary>], iteration_bounds = array<i64: 1, 1, 1>, scalar_prefetch = 0 : i64, scratch_operands = 1 : i64, tpu.core_type = #tpu.core_type<tc>, window_params = [{transform_indices = @transform_0, window_bounds = array<i64: 16, 128>}, {pipeline_mode = #tpu.pipeline_mode<synchronous>, transform_indices = @transform_1, window_bounds = array<i64: 128, 128>}, {transform_indices = @transform_2, window_bounds = array<i64: 128, 128>}, {transform_indices = @transform_3, window_bounds = array<i64: 1, 128>}, {transform_indices = @transform_4, window_bounds = array<i64: 16, 128>}]} {
    %c0_i32 = arith.constant 0 : i32
    %0 = arith.cmpi eq, %arg2, %c0_i32 : i32
    %1 = arith.extui %0 : i1 to i32
    %c0_i32_0 = arith.constant 0 : i32
    %2 = arith.cmpi ne, %1, %c0_i32_0 : i32
    scf.if %2 {
      %c0_8 = arith.constant 0 : index
      %c0_9 = arith.constant 0 : index
      %10 = vector.load %arg3[%c0_8, %c0_9] : memref<16x128xf32, #tpu.memory_space<vmem>>, vector<16x128xf32>
      %c0_10 = arith.constant 0 : index
      %c0_11 = arith.constant 0 : index
      %11 = vector.load %arg4[%c0_10, %c0_11] : memref<128x128xf32, #tpu.memory_space<vmem>>, vector<128x128xf32>
      %cst_12 = arith.constant dense<0.000000e+00> : vector<16x128xf32>
      %12 = tpu.matmul %10, %11, %cst_12 {dimension_numbers = #tpu.dot_dimension_numbers<[1], [0], [0], [1], [0, 0, 1, 1], [], []>} : vector<16x128xf32>, vector<128x128xf32>, vector<16x128xf32> -> vector<16x128xf32>
      %c0_13 = arith.constant 0 : index
      %c0_14 = arith.constant 0 : index
      %13 = vector.load %arg8[%c0_13, %c0_14] : memref<16x128xf32, #tpu.memory_space<vmem>>, vector<16x128xf32>
      tpu.vector_store %arg8[%c0_13, %c0_14], %12 {strides = array<i32>} : memref<16x128xf32, #tpu.memory_space<vmem>>, vector<16x128xf32>,
    } else {
    }
    %c0 = arith.constant 0 : index
    %c0_1 = arith.constant 0 : index
    %3 = vector.load %arg8[%c0, %c0_1] : memref<16x128xf32, #tpu.memory_space<vmem>>, vector<16x128xf32>
    %c0_2 = arith.constant 0 : index
    %c0_3 = arith.constant 0 : index
    %4 = vector.load %arg5[%c0_2, %c0_3] : memref<128x128xf32, #tpu.memory_space<vmem>>, vector<128x128xf32>
    %cst = arith.constant dense<0.000000e+00> : vector<16x128xf32>
    %5 = tpu.matmul %3, %4, %cst {dimension_numbers = #tpu.dot_dimension_numbers<[1], [0], [0], [1], [0, 0, 1, 1], [], []>} : vector<16x128xf32>, vector<128x128xf32>, vector<16x128xf32> -> vector<16x128xf32>
    %c0_4 = arith.constant 0 : index
    %c0_5 = arith.constant 0 : index
    %6 = vector.load %arg6[%c0_4, %c0_5] : memref<1x128xf32, #tpu.memory_space<vmem>>, vector<1x128xf32>
    %7 = vector.broadcast %6 : vector<1x128xf32> to vector<16x128xf32>
    %8 = arith.addf %5, %7 : vector<16x128xf32>
    %c0_6 = arith.constant 0 : index
    %c0_7 = arith.constant 0 : index
    %9 = vector.load %arg7[%c0_6, %c0_7] : memref<16x128xf32, #tpu.memory_space<vmem>>, vector<16x128xf32>
    tpu.vector_store %arg7[%c0_6, %c0_7], %8 {strides = array<i32>} : memref<16x128xf32, #tpu.memory_space<vmem>>, vector<16x128xf32>,
    return
  }
  func.func @transform_0(%arg0: i32, %arg1: i32, %arg2: i32) -> (i32, i32) {
    %c0_i32 = arith.constant 0 : i32
    %c0_i32_0 = arith.constant 0 : i32
    return %arg0, %c0_i32 : i32, i32
  }
  func.func @transform_1(%arg0: i32, %arg1: i32, %arg2: i32) -> (i32, i32) {
    %c0_i32 = arith.constant 0 : i32
    %c0_i32_0 = arith.constant 0 : i32
    %c0_i32_1 = arith.constant 0 : i32
    return %c0_i32, %c0_i32_0 : i32, i32
  }
  func.func @transform_2(%arg0: i32, %arg1: i32, %arg2: i32) -> (i32, i32) {
    %c1_i32 = arith.constant 1 : i32
    %0 = arith.muli %arg1, %c1_i32 : i32
    %1 = arith.addi %0, %arg2 : i32
    %c0_i32 = arith.constant 0 : i32
    %c0_i32_0 = arith.constant 0 : i32
    return %c0_i32, %1 : i32, i32
  }
  func.func @transform_3(%arg0: i32, %arg1: i32, %arg2: i32) -> (i32, i32) {
    %c1_i32 = arith.constant 1 : i32
    %0 = arith.muli %arg1, %c1_i32 : i32
    %1 = arith.addi %0, %arg2 : i32
    %c0_i32 = arith.constant 0 : i32
    %c0_i32_0 = arith.constant 0 : i32
    return %c0_i32, %1 : i32, i32
  }
  func.func @transform_4(%arg0: i32, %arg1: i32, %arg2: i32) -> (i32, i32) {
    %c1_i32 = arith.constant 1 : i32
    %0 = arith.muli %arg1, %c1_i32 : i32
    %1 = arith.addi %0, %arg2 : i32
    %c0_i32 = arith.constant 0 : i32
    return %arg0, %1 : i32, i32
  }
}

</mosaic_0001>

<bundles_post_ra>
// kernel: svd_wrapper_forward.1
= control target key start
LH: loop header
LB: loop body
LE: loop exit
PB: predicated region body
PF: predicated region fallthrough
CT: control target
= control target key end

     0   :  { %9 = vsyncpa [#allocation4], 0  ;;  %s339_s0 = inlined_call_operand.vmem [shape: f32[16,128], index: 0, kind: input, shape index: {}]   ;;  %s340_s1 = inlined_call_operand.hbm [shape: f32[128,128], index: 1, kind: input, shape index: {}]   ;;  %s341_s2 = inlined_call_operand.hbm [shape: f32[128,128], index: 2, kind: input, shape index: {}]   ;;  %s342_s3 = inlined_call_operand.vmem [shape: f32[1,128], index: 3, kind: input, shape index: {}]   ;;  %s343_s4 = inlined_call_operand.vmem [shape: f32[16,128], index: 4, kind: output, shape index: {}]  }
   0x1   :  { %s17_s17 = sshll.u32 %s340_s1, 4  ;;  %s18_s17 = int_to_ptr.hbm [resolvable:$true] %s17_s17 }
   0x2   :  { %10 = vsyncpa [#allocation6], 0  ;;  %s289_s18 = smov [#allocation3]   ;;  %s33_s22 = sshll.u32 %s341_s2, 4  ;;  %s34_s22 = int_to_ptr.hbm [resolvable:$true] %s33_s22 }
   0x3   :  { %s19_s19 = sshll.u32 %s289_s18, 4  ;;  %s290_s23 = smov 128   ;;  %s20_s19 = int_to_ptr.vmem [resolvable:$true] %s19_s19 }
   0x4   :  { %s291_s24 = smov 8   ;;  %s292_s25 = smov [#allocation5]  }
   0x5   :  { %25 = dma.hbm_to_vmem [thread:$0]  %s18_s17, 2048, %s20_s19, [#allocation4], %s290_s23, %s290_s23, %s291_s24  }
   0x6   :  { %s35_s26 = sshll.u32 %s292_s25, 4  ;;  %s36_s26 = int_to_ptr.vmem [resolvable:$true] %s35_s26 }
   0x7   :  { %41 = dma.hbm_to_vmem [thread:$0]  %s34_s22, 2048, %s36_s26, [#allocation6], %s290_s23, %s290_s23, %s291_s24  }
   0x8   :  { %285 = dma.done.wait [#allocation4], 2048  }
   0x9   :  { %286 = vsyncadd [#allocation4], 4294965248 }
   0xa   :  { %287 = dma.done.wait [#allocation6], 2048  }
   0xb   :  { %288 = vsyncadd [#allocation6], 4294965248  ;;  %v99_v0 = vld [vmem:[#allocation3 + $0x78] sm:$0xff]  ;;  %v98_v1 = vld [vmem:[#allocation3 + $0x70] sm:$0xff] }
   0xc   :  { %200 = vmatpush.msra.mxu2 %v99_v0  ;;  %100 = vmatpush.msra.mxu0 %v99_v0  ;;  %v97_v2 = vld [vmem:[#allocation3 + $0x68] sm:$0xff]  ;;  %v96_v3 = vld [vmem:[#allocation3 + $0x60] sm:$0xff]  ;;  %v95_v4 = vld [vmem:[#allocation3 + $0x58] sm:$0xff] }
   0xd   :  { %v142_v5 = vld [vmem:[#allocation5 + $0x78] sm:$0xff]  ;;  %v141_v6 = vld [vmem:[#allocation5 + $0x70] sm:$0xff]  ;;  %v140_v8 = vld [vmem:[#allocation5 + $0x68] sm:$0xff] }
   0xe   :  { %201 = vmatpush.msra.mxu2 %v98_v1  ;;  %101 = vmatpush.msra.mxu0 %v98_v1  ;;  %v94_v7 = vld [vmem:[#allocation3 + $0x50] sm:$0xff]  ;;  %v93_v9 = vld [vmem:[#allocation3 + $0x48] sm:$0xff]  ;;  %v139_v10 = vld [vmem:[#allocation5 + $0x60] sm:$0xff] }
   0xf   :  { %216 = vmatpush.msra.mxu3 %v142_v5  ;;  %147 = vmatpush.msra.mxu1 %v142_v5  ;;  %v92_v11 = vld [vmem:[#allocation3 + $0x40] sm:$0xff]  ;;  %v138_v12 = vld [vmem:[#allocation5 + $0x58] sm:$0xff]  ;;  %v137_v14 = vld [vmem:[#allocation5 + $0x50] sm:$0xff] }
  0x10   :  { %202 = vmatpush.msra.mxu2 %v97_v2  ;;  %102 = vmatpush.msra.mxu0 %v97_v2  ;;  %v91_v13 = vld [vmem:[#allocation3 + $0x38] sm:$0xff]  ;;  %v90_v15 = vld [vmem:[#allocation3 + $0x30] sm:$0xff]  ;;  %v136_v16 = vld [vmem:[#allocation5 + $0x48] sm:$0xff] }
  0x11   :  { %217 = vmatpush.msra.mxu3 %v141_v6  ;;  %148 = vmatpush.msra.mxu1 %v141_v6  ;;  %v89_v17 = vld [vmem:[#allocation3 + $0x28] sm:$0xff]  ;;  %v135_v18 = vld [vmem:[#allocation5 + $0x40] sm:$0xff]  ;;  %v134_v20 = vld [vmem:[#allocation5 + $0x38] sm:$0xff] }
  0x12   :  { %203 = vmatpush.msra.mxu2 %v96_v3  ;;  %103 = vmatpush.msra.mxu0 %v96_v3  ;;  %v88_v19 = vld [vmem:[#allocation3 + $0x20] sm:$0xff]  ;;  %v87_v21 = vld [vmem:[#allocation3 + $0x18] sm:$0xff]  ;;  %v133_v22 = vld [vmem:[#allocation5 + $0x30] sm:$0xff] }
  0x13   :  { %218 = vmatpush.msra.mxu3 %v140_v8  ;;  %149 = vmatpush.msra.mxu1 %v140_v8  ;;  %v86_v23 = vld [vmem:[#allocation3 + $0x10] sm:$0xff]  ;;  %v132_v24 = vld [vmem:[#allocation5 + $0x28] sm:$0xff]  ;;  %v131_v26 = vld [vmem:[#allocation5 + $0x20] sm:$0xff] }
  0x14   :  { %204 = vmatpush.msra.mxu2 %v95_v4  ;;  %104 = vmatpush.msra.mxu0 %v95_v4  ;;  %v85_v25 = vld [vmem:[#allocation3 + $0x8] sm:$0xff]  ;;  %v84_v27 = vld [vmem:[#allocation3] sm:$0xff]  ;;  %v130_v30 = vld [vmem:[#allocation5 + $0x18] sm:$0xff] }
  0x15   :  { %219 = vmatpush.msra.mxu3 %v139_v10  ;;  %150 = vmatpush.msra.mxu1 %v139_v10  ;;  %v83_v28 = vld [vmem:[%s339_s0 + $0x8] sm:$0xff]  ;;  %v82_v29 = vld [vmem:[%s339_s0] sm:$0xff]  ;;  %v129_v31 = vld [vmem:[#allocation5 + $0x10] sm:$0xff] }
  0x16   :  { %205 = vmatpush.msra.mxu2 %v94_v7  ;;  %105 = vmatpush.msra.mxu0 %v94_v7  ;;  %v128_v32 = vld [vmem:[#allocation5 + $0x8] sm:$0xff]  ;;  %v127_v33 = vld [vmem:[#allocation5] sm:$0xff] }
  0x17   :  { %220 = vmatpush.msra.mxu3 %v138_v12  ;;  %151 = vmatpush.msra.mxu1 %v138_v12  ;;  %v236_v36 = vld [vmem:[%s342_s3] ss:$0 sm:$0xff] }
  0x18   :  { %206 = vmatpush.msra.mxu2 %v93_v9  ;;  %106 = vmatpush.msra.mxu0 %v93_v9 }
  0x19   :  { %221 = vmatpush.msra.mxu3 %v137_v14  ;;  %152 = vmatpush.msra.mxu1 %v137_v14 }
  0x1a   :  { %207 = vmatpush.msra.mxu2 %v92_v11  ;;  %107 = vmatpush.msra.mxu0 %v92_v11 }
  0x1b   :  { %222 = vmatpush.msra.mxu3 %v136_v16  ;;  %153 = vmatpush.msra.mxu1 %v136_v16 }
  0x1c   :  { %208 = vmatpush.msra.mxu2 %v91_v13  ;;  %108 = vmatpush.msra.mxu0 %v91_v13 }
  0x1d   :  { %223 = vmatpush.msra.mxu3 %v135_v18  ;;  %154 = vmatpush.msra.mxu1 %v135_v18 }
  0x1e   :  { %209 = vmatpush.msra.mxu2 %v90_v15  ;;  %109 = vmatpush.msra.mxu0 %v90_v15 }
  0x1f   :  { %224 = vmatpush.msra.mxu3 %v134_v20  ;;  %155 = vmatpush.msra.mxu1 %v134_v20 }
  0x20   :  { %210 = vmatpush.msra.mxu2 %v89_v17  ;;  %110 = vmatpush.msra.mxu0 %v89_v17 }
  0x21   :  { %225 = vmatpush.msra.mxu3 %v133_v22  ;;  %156 = vmatpush.msra.mxu1 %v133_v22 }
  0x22   :  { %211 = vmatpush.msra.mxu2 %v88_v19  ;;  %111 = vmatpush.msra.mxu0 %v88_v19 }
  0x23   :  { %226 = vmatpush.msra.mxu3 %v132_v24  ;;  %157 = vmatpush.msra.mxu1 %v132_v24 }
  0x24   :  { %212 = vmatpush.msra.mxu2 %v87_v21  ;;  %112 = vmatpush.msra.mxu0 %v87_v21 }
  0x25   :  { %227 = vmatpush.msra.mxu3 %v131_v26  ;;  %158 = vmatpush.msra.mxu1 %v131_v26 }
  0x26   :  { %213 = vmatpush.msra.mxu2 %v86_v23  ;;  %113 = vmatpush.msra.mxu0 %v86_v23 }
  0x27   :  { %228 = vmatpush.msra.mxu3 %v130_v30  ;;  %159 = vmatpush.msra.mxu1 %v130_v30 }
  0x28   :  { %214 = vmatpush.msra.mxu2 %v85_v25  ;;  %114 = vmatpush.msra.mxu0 %v85_v25 }
  0x29   :  { %229 = vmatpush.msra.mxu3 %v129_v31  ;;  %160 = vmatpush.msra.mxu1 %v129_v31 }
  0x2a   :  { %215 = vmatpush.msra.mxu2 %v84_v27  ;;  %115 = vmatpush.msra.mxu0 %v84_v27 }
  0x2b   :  { %119 = vmatmul.f32.vlgmr.msra.gmra.mxu2 %v83_v28  ;;  %116 = vmatmul.f32.vlgmr.msra.gmra.mxu0 %v82_v29 }
  0x2c   :  { %230 = vmatpush.msra.mxu3 %v128_v32  ;;  %161 = vmatpush.msra.mxu1 %v128_v32 }
  0x2e   :  { %231 = vmatpush.msra.mxu3 %v127_v33  ;;  %162 = vmatpush.msra.mxu1 %v127_v33 }
  0xa8   :  { %v117_v34 = vpop.f32.mrf.mxu0 }
  0xa9   :  { %163 = vmatmul.f32.vlgmr.msra.gmra.mxu1 %v117_v34 }
  0xae   :  { %v120_v35 = vpop.f32.mrf.mxu2 }
  0xaf   :  { %166 = vmatmul.f32.vlgmr.msra.gmra.mxu3 %v120_v35 }
 0x126   :  { %v164_v37 = vpop.f32.mrf.mxu1 }
 0x127   :  { %v165_v38 = vadd.f32 %v236_v36, %v164_v37 }
 0x129   :  { %170 = vst [vmem:[%s343_s4] sm:$0xff] %v165_v38 }
 0x132   :  { %v167_v39 = vpop.f32.mrf.mxu3 }
 0x133   :  { %v168_v40 = vadd.f32 %v236_v36, %v167_v39 }
 0x135   :  { %171 = vst [vmem:[%s343_s4 + $0x8] sm:$0xff] %v168_v40 }
 0x136   :  { %187 = vsyncpa [#allocation4], 1 }
 0x137   :  { %188 = vsyncpa [#allocation6], 1 }

</bundles_post_ra>
